<compile_context>
chip_gen: v7x
topology: tpu7x:2x2x1
jax: 0.10.0
libtpu: 0.0.40
codegen_flags: <defaults>
</compile_context>

<pallas_src>
import functools

import jax
import jax.numpy as jnp
from jax.experimental import pallas as pl
from jax.experimental.pallas import tpu as pltpu

LANE = 128


def _round_up(x, m):
    return (x + m - 1) // m * m


def _pad_dim(d):
    # 256-granule for wide layers feeds v6e/v7x's 2x256 MXU better; 128 for small dims.
    # TODO(synk): keep the 128-granule on v5e (4x128 MXU) once layers exceed 256 features.
    return _round_up(d, 256) if d > 128 else LANE


def _mlp_kernel(activation, out_dims_pad, x_ref, *refs):
    """Fused forward. refs = (w_0, ..., w_L, bias_slab, out). BN already folded."""
    *w_refs, b_ref, out_ref = refs
    num_layers = len(w_refs)

    h_mxu = x_ref[...]                      # bf16, lane-dense: straight into the MXU
    off = 0
    for li in range(num_layers):
        d = out_dims_pad[li]
        bias = b_ref[:, off:off + d]        # (1, d) f32, static lane-aligned slice
        off += d
        # bf16 operands into the MXU, f32 accumulation; elementwise math stays f32.
        h = jnp.dot(h_mxu, w_refs[li][...], preferred_element_type=jnp.float32) + bias
        if li < num_layers - 1:
            if activation == "relu":
                h = jnp.maximum(h, 0.0)
            elif activation == "tanh":
                h = jnp.tanh(h)
            elif activation == "leaky_relu":
                h = jnp.maximum(h, 0.2 * h)   # nn.LeakyReLU(0.2); single VALU max
            else:
                raise ValueError(f"Unsupported activation: {activation}")
            # Dropout: identity in eval mode.
            h_mxu = h.astype(jnp.bfloat16)
        else:
            # Sigmoid via tanh: one EUP push, result exactly in [0, 1].
            out_ref[...] = (0.5 * jnp.tanh(0.5 * h) + 0.5).astype(out_ref.dtype)


def init_folded_params(key, input_dim, hidden_dims, output_dim, eps=1e-5,
                       weight_dtype=jnp.bfloat16):
    """PyTorch-equivalent params (kaiming_normal_ weights, zero biases, BatchNorm1d at
    default running stats), BN folded into the preceding Linear, every feature dim
    zero-padded to the lane granule, biases packed into one lane-dense f32 slab."""
    dims = [input_dim] + list(hidden_dims) + [output_dim]
    dims_pad = [_pad_dim(d) for d in dims]

    weights, biases = [], []
    for li in range(len(dims) - 1):
        d_in, d_out = dims[li], dims[li + 1]
        key, k = jax.random.split(key)
        std = (2.0 / d_in) ** 0.5                                    # kaiming_normal_, fan_in
        w = std * jax.random.normal(k, (d_in, d_out), jnp.float32)   # (in, out) = torch W.T
        b = jnp.zeros((d_out,), jnp.float32)

        if li < len(hidden_dims):
            # BatchNorm1d (eval) fold; defaults: gamma=1, beta=0, running mean=0, var=1.
            # TODO(synk): fold the actual running stats when loading a trained checkpoint.
            gamma = jnp.ones((d_out,), jnp.float32)
            beta = jnp.zeros((d_out,), jnp.float32)
            mean = jnp.zeros((d_out,), jnp.float32)
            var = jnp.ones((d_out,), jnp.float32)
            scale = gamma / jnp.sqrt(var + eps)
            w = w * scale[None, :]
            b = (b - mean) * scale + beta

        w_p = jnp.zeros((dims_pad[li], dims_pad[li + 1]), jnp.float32)
        w_p = w_p.at[:d_in, :d_out].set(w)
        b_p = jnp.zeros((dims_pad[li + 1],), jnp.float32).at[:d_out].set(b)
        weights.append(w_p.astype(weight_dtype))
        biases.append(b_p)

    bias_slab = jnp.concatenate(biases)[None, :]   # (1, sum(dims_pad[1:])) f32
    return weights, bias_slab, tuple(dims_pad)


def _select_tiling(batch, dims_pad, param_bytes):
    """Batch tile + vmem limit from this generation's physical VMEM
    (v5e/v6e: 128 MiB, v7x: 64 MiB per TensorCore)."""
    try:
        phys_vmem = int(pltpu.get_tpu_info().vmem_capacity_bytes)
    except Exception:
        phys_vmem = 64 << 20                 # conservative (v7x per-core) fallback
    vmem_limit = phys_vmem * 3 // 4          # headroom for compiler internal scratch

    d_in_pad, d_out_pad = dims_pad[0], dims_pad[-1]
    # Per batch-row cost: double-buffered bf16 input/output tiles plus the widest f32
    # intermediate activation held live between matmuls.
    bytes_per_row = 2 * 2 * (d_in_pad + d_out_pad) + 4 * max(dims_pad)
    avail = vmem_limit - 2 * param_bytes - (2 << 20)   # params stay resident (x2 margin)
    max_rows = max(16, (avail // bytes_per_row) // 16 * 16) if avail > 0 else 16

    tile = int(min(512, max_rows))
    if batch >= 512:
        # Keep the "parallel" batch grid >= 2 steps so both v7x TensorCores get work.
        tile = min(tile, _round_up((batch + 1) // 2, 16))
    tile = min(tile, _round_up(batch, 16))   # don't over-pad tiny batches
    tile = max(16, tile)                     # 16-row granule: bf16 sublane packing
    b_pad = _round_up(batch, tile)
    return tile, b_pad, vmem_limit


def simple_nn_forward(x, weights, bias_slab, dims_pad, *, activation, output_dim,
                      batch_tile=None):
    batch, in_dim = x.shape
    d_in_pad, d_out_pad = dims_pad[0], dims_pad[-1]

    param_bytes = sum(int(w.size) * w.dtype.itemsize for w in weights)
    param_bytes += int(bias_slab.size) * bias_slab.dtype.itemsize
    tile, b_pad, vmem_limit = _select_tiling(batch, dims_pad, param_bytes)
    if batch_tile is not None:
        tile = batch_tile
        b_pad = _round_up(batch, tile)

    # Cast + zero-pad in the wrapper; kernel consumes bf16 directly as the first MXU LHS.
    x_p = jnp.pad(x.astype(jnp.bfloat16),
                  ((0, b_pad - batch), (0, d_in_pad - in_dim)))

    kernel = functools.partial(_mlp_kernel, activation, tuple(dims_pad[1:]))
    vmem = pltpu.MemorySpace.VMEM

    def build(single_buffer_params):
        pmode = {"pipeline_mode": pl.Buffered(1)} if single_buffer_params else {}
        in_specs = [pl.BlockSpec((tile, d_in_pad), lambda i: (i, 0), memory_space=vmem)]
        # Constant block index -> parameters stay VMEM-resident across batch tiles.
        in_specs += [pl.BlockSpec(w.shape, lambda i: (0, 0), memory_space=vmem, **pmode)
                     for w in weights]
        in_specs += [pl.BlockSpec(bias_slab.shape, lambda i: (0, 0),
                                  memory_space=vmem, **pmode)]
        out_spec = pl.BlockSpec((tile, d_out_pad), lambda i: (i, 0), memory_space=vmem)
        return pl.pallas_call(
            kernel,
            out_shape=jax.ShapeDtypeStruct((b_pad, d_out_pad), jnp.bfloat16),
            grid=(b_pad // tile,),
            in_specs=in_specs,
            out_specs=out_spec,
            compiler_params=pltpu.CompilerParams(
                # Batch axis is independent -> shardable across v7x's 2 TensorCores.
                dimension_semantics=("parallel",),
                vmem_limit_bytes=int(vmem_limit),
            ),
        )

    try:
        out = build(True)(x_p, *weights, bias_slab)
    except Exception:
        # Fallback if this JAX build rejects single-buffered (Buffered(1)) params.
        out = build(False)(x_p, *weights, bias_slab)

    return out[:batch, :output_dim]


if __name__ == "__main__":
    INPUT_DIM = 32
    HIDDEN_DIMS = [64, 32]
    OUTPUT_DIM = 8
    ACTIVATION = "relu"
    DROPOUT = 0.1            # identity in eval mode
    BATCH = 8

    key = jax.random.PRNGKey(0)
    key, kx = jax.random.split(key)
    x = jax.random.normal(kx, (BATCH, INPUT_DIM), jnp.float32)

    weights, bias_slab, dims_pad = init_folded_params(
        key, INPUT_DIM, HIDDEN_DIMS, OUTPUT_DIM)

    out = simple_nn_forward(
        x, weights, bias_slab, dims_pad,
        activation=ACTIVATION, output_dim=OUTPUT_DIM)
    out = jax.block_until_ready(out)

    # Pure-JAX f32 reference on the same folded/padded params.
    def reference(xv):
        h = jnp.pad(xv, ((0, 0), (0, dims_pad[0] - INPUT_DIM)))
        off = 0
        for li, w in enumerate(weights):
            d = dims_pad[li + 1]
            b = bias_slab[0, off:off + d]
            off += d
            h = h @ w.astype(jnp.float32) + b
            if li < len(weights) - 1:
                if ACTIVATION == "relu":
                    h = jnp.maximum(h, 0.0)
                elif ACTIVATION == "tanh":
                    h = jnp.tanh(h)
                else:
                    h = jnp.maximum(h, 0.2 * h)
        return jax.nn.sigmoid(h)[:, :OUTPUT_DIM]

    ref = reference(x)
    out_f32 = out.astype(jnp.float32)
    assert out.shape == (BATCH, OUTPUT_DIM)
    assert out.dtype == jnp.bfloat16
    assert bool(jnp.all(jnp.isfinite(out_f32)))
    assert bool(jnp.all((out_f32 >= 0.0) & (out_f32 <= 1.0)))
    max_err = float(jnp.max(jnp.abs(out_f32 - ref)))
    assert max_err < 5e-2, max_err   # bf16 weights/activations/output tolerance
    print("KERNEL_OK")
</pallas_src>

<mosaic_0001>
module attributes {stable_mosaic.version = 11 : i64} {
  func.func @_mlp_kernel(%arg0: i32, %arg1: memref<16x128xbf16, #tpu.memory_space<vmem>>, %arg2: memref<128x128xbf16, #tpu.memory_space<vmem>>, %arg3: memref<128x128xbf16, #tpu.memory_space<vmem>>, %arg4: memref<128x128xbf16, #tpu.memory_space<vmem>>, %arg5: memref<1x384xf32, #tpu.memory_space<vmem>>, %arg6: memref<16x128xbf16, #tpu.memory_space<vmem>>) attributes {dimension_semantics = [#tpu.dimension_semantics<parallel>], iteration_bounds = array<i64: 1>, scalar_prefetch = 0 : i64, scratch_operands = 0 : i64, tpu.core_type = #tpu.core_type<tc>, window_params = [{transform_indices = @transform_0, window_bounds = array<i64: 16, 128>}, {pipeline_mode = #tpu.pipeline_mode<synchronous>, transform_indices = @transform_1, window_bounds = array<i64: 128, 128>}, {pipeline_mode = #tpu.pipeline_mode<synchronous>, transform_indices = @transform_2, window_bounds = array<i64: 128, 128>}, {pipeline_mode = #tpu.pipeline_mode<synchronous>, transform_indices = @transform_3, window_bounds = array<i64: 128, 128>}, {pipeline_mode = #tpu.pipeline_mode<synchronous>, transform_indices = @transform_4, window_bounds = array<i64: 1, 384>}, {transform_indices = @transform_5, window_bounds = array<i64: 16, 128>}]} {
    %c0 = arith.constant 0 : index
    %c0_0 = arith.constant 0 : index
    %0 = vector.load %arg1[%c0, %c0_0] : memref<16x128xbf16, #tpu.memory_space<vmem>>, vector<16x128xbf16>
    %c0_1 = arith.constant 0 : index
    %c0_2 = arith.constant 0 : index
    %1 = vector.load %arg5[%c0_1, %c0_2] : memref<1x384xf32, #tpu.memory_space<vmem>>, vector<1x128xf32>
    %c0_3 = arith.constant 0 : index
    %c0_4 = arith.constant 0 : index
    %2 = vector.load %arg2[%c0_3, %c0_4] : memref<128x128xbf16, #tpu.memory_space<vmem>>, vector<128x128xbf16>
    %cst = arith.constant dense<0.000000e+00> : vector<16x128xf32>
    %3 = tpu.matmul %0, %2, %cst {dimension_numbers = #tpu.dot_dimension_numbers<[1], [0], [0], [1], [0, 0, 1, 1], [], []>} : vector<16x128xbf16>, vector<128x128xbf16>, vector<16x128xf32> -> vector<16x128xf32>
    %4 = vector.broadcast %1 : vector<1x128xf32> to vector<16x128xf32>
    %5 = arith.addf %3, %4 : vector<16x128xf32>
    %cst_5 = arith.constant 0.000000e+00 : f32
    %6 = vector.broadcast %cst_5 : f32 to vector<16x128xf32>
    %7 = arith.maximumf %5, %6 : vector<16x128xf32>
    %8 = arith.truncf %7 : vector<16x128xf32> to vector<16x128xbf16>
    %c0_6 = arith.constant 0 : index
    %c128 = arith.constant 128 : index
    %9 = vector.load %arg5[%c0_6, %c128] : memref<1x384xf32, #tpu.memory_space<vmem>>, vector<1x128xf32>
    %c0_7 = arith.constant 0 : index
    %c0_8 = arith.constant 0 : index
    %10 = vector.load %arg3[%c0_7, %c0_8] : memref<128x128xbf16, #tpu.memory_space<vmem>>, vector<128x128xbf16>
    %cst_9 = arith.constant dense<0.000000e+00> : vector<16x128xf32>
    %11 = tpu.matmul %8, %10, %cst_9 {dimension_numbers = #tpu.dot_dimension_numbers<[1], [0], [0], [1], [0, 0, 1, 1], [], []>} : vector<16x128xbf16>, vector<128x128xbf16>, vector<16x128xf32> -> vector<16x128xf32>
    %12 = vector.broadcast %9 : vector<1x128xf32> to vector<16x128xf32>
    %13 = arith.addf %11, %12 : vector<16x128xf32>
    %cst_10 = arith.constant 0.000000e+00 : f32
    %14 = vector.broadcast %cst_10 : f32 to vector<16x128xf32>
    %15 = arith.maximumf %13, %14 : vector<16x128xf32>
    %16 = arith.truncf %15 : vector<16x128xf32> to vector<16x128xbf16>
    %c0_11 = arith.constant 0 : index
    %c256 = arith.constant 256 : index
    %17 = vector.load %arg5[%c0_11, %c256] : memref<1x384xf32, #tpu.memory_space<vmem>>, vector<1x128xf32>
    %c0_12 = arith.constant 0 : index
    %c0_13 = arith.constant 0 : index
    %18 = vector.load %arg4[%c0_12, %c0_13] : memref<128x128xbf16, #tpu.memory_space<vmem>>, vector<128x128xbf16>
    %cst_14 = arith.constant dense<0.000000e+00> : vector<16x128xf32>
    %19 = tpu.matmul %16, %18, %cst_14 {dimension_numbers = #tpu.dot_dimension_numbers<[1], [0], [0], [1], [0, 0, 1, 1], [], []>} : vector<16x128xbf16>, vector<128x128xbf16>, vector<16x128xf32> -> vector<16x128xf32>
    %20 = vector.broadcast %17 : vector<1x128xf32> to vector<16x128xf32>
    %21 = arith.addf %19, %20 : vector<16x128xf32>
    %cst_15 = arith.constant 5.000000e-01 : f32
    %22 = vector.broadcast %cst_15 : f32 to vector<16x128xf32>
    %23 = arith.mulf %22, %21 : vector<16x128xf32>
    %24 = math.tanh %23 : vector<16x128xf32>
    %cst_16 = arith.constant 5.000000e-01 : f32
    %25 = vector.broadcast %cst_16 : f32 to vector<16x128xf32>
    %26 = arith.mulf %25, %24 : vector<16x128xf32>
    %cst_17 = arith.constant 5.000000e-01 : f32
    %27 = vector.broadcast %cst_17 : f32 to vector<16x128xf32>
    %28 = arith.addf %26, %27 : vector<16x128xf32>
    %29 = arith.truncf %28 : vector<16x128xf32> to vector<16x128xbf16>
    %c0_18 = arith.constant 0 : index
    %c0_19 = arith.constant 0 : index
    %30 = vector.load %arg6[%c0_18, %c0_19] : memref<16x128xbf16, #tpu.memory_space<vmem>>, vector<16x128xbf16>
    tpu.vector_store %arg6[%c0_18, %c0_19], %29 {strides = array<i32>} : memref<16x128xbf16, #tpu.memory_space<vmem>>, vector<16x128xbf16>,
    return
  }
  func.func @transform_0(%arg0: i32) -> (i32, i32) {
    %c0_i32 = arith.constant 0 : i32
    %c0_i32_0 = arith.constant 0 : i32
    return %arg0, %c0_i32 : i32, i32
  }
  func.func @transform_1(%arg0: i32) -> (i32, i32) {
    %c0_i32 = arith.constant 0 : i32
    %c0_i32_0 = arith.constant 0 : i32
    %c0_i32_1 = arith.constant 0 : i32
    return %c0_i32, %c0_i32_0 : i32, i32
  }
  func.func @transform_2(%arg0: i32) -> (i32, i32) {
    %c0_i32 = arith.constant 0 : i32
    %c0_i32_0 = arith.constant 0 : i32
    %c0_i32_1 = arith.constant 0 : i32
    return %c0_i32, %c0_i32_0 : i32, i32
  }
  func.func @transform_3(%arg0: i32) -> (i32, i32) {
    %c0_i32 = arith.constant 0 : i32
    %c0_i32_0 = arith.constant 0 : i32
    %c0_i32_1 = arith.constant 0 : i32
    return %c0_i32, %c0_i32_0 : i32, i32
  }
  func.func @transform_4(%arg0: i32) -> (i32, i32) {
    %c0_i32 = arith.constant 0 : i32
    %c0_i32_0 = arith.constant 0 : i32
    %c0_i32_1 = arith.constant 0 : i32
    return %c0_i32, %c0_i32_0 : i32, i32
  }
  func.func @transform_5(%arg0: i32) -> (i32, i32) {
    %c0_i32 = arith.constant 0 : i32
    %c0_i32_0 = arith.constant 0 : i32
    return %arg0, %c0_i32 : i32, i32
  }
}

module attributes {stable_mosaic.version = 11 : i64} {
  func.func @_mlp_kernel(%arg0: i32, %arg1: memref<16x128xbf16, #tpu.memory_space<vmem>>, %arg2: memref<128x128xbf16, #tpu.memory_space<vmem>>, %arg3: memref<128x128xbf16, #tpu.memory_space<vmem>>, %arg4: memref<128x128xbf16, #tpu.memory_space<vmem>>, %arg5: memref<1x384xf32, #tpu.memory_space<vmem>>, %arg6: memref<16x128xbf16, #tpu.memory_space<vmem>>) attributes {dimension_semantics = [#tpu.dimension_semantics<parallel>], iteration_bounds = array<i64: 1>, scalar_prefetch = 0 : i64, scratch_operands = 0 : i64, tpu.core_type = #tpu.core_type<tc>, window_params = [{transform_indices = @transform_0, window_bounds = array<i64: 16, 128>}, {pipeline_mode = #tpu.pipeline_mode<synchronous>, transform_indices = @transform_1, window_bounds = array<i64: 128, 128>}, {pipeline_mode = #tpu.pipeline_mode<synchronous>, transform_indices = @transform_2, window_bounds = array<i64: 128, 128>}, {pipeline_mode = #tpu.pipeline_mode<synchronous>, transform_indices = @transform_3, window_bounds = array<i64: 128, 128>}, {pipeline_mode = #tpu.pipeline_mode<synchronous>, transform_indices = @transform_4, window_bounds = array<i64: 1, 384>}, {transform_indices = @transform_5, window_bounds = array<i64: 16, 128>}]} {
    %c0 = arith.constant 0 : index
    %c0_0 = arith.constant 0 : index
    %0 = vector.load %arg1[%c0, %c0_0] : memref<16x128xbf16, #tpu.memory_space<vmem>>, vector<16x128xbf16>
    %c0_1 = arith.constant 0 : index
    %c0_2 = arith.constant 0 : index
    %1 = vector.load %arg5[%c0_1, %c0_2] : memref<1x384xf32, #tpu.memory_space<vmem>>, vector<1x128xf32>
    %c0_3 = arith.constant 0 : index
    %c0_4 = arith.constant 0 : index
    %2 = vector.load %arg2[%c0_3, %c0_4] : memref<128x128xbf16, #tpu.memory_space<vmem>>, vector<128x128xbf16>
    %cst = arith.constant dense<0.000000e+00> : vector<16x128xf32>
    %3 = tpu.matmul %0, %2, %cst {dimension_numbers = #tpu.dot_dimension_numbers<[1], [0], [0], [1], [0, 0, 1, 1], [], []>} : vector<16x128xbf16>, vector<128x128xbf16>, vector<16x128xf32> -> vector<16x128xf32>
    %4 = vector.broadcast %1 : vector<1x128xf32> to vector<16x128xf32>
    %5 = arith.addf %3, %4 : vector<16x128xf32>
    %cst_5 = arith.constant 0.000000e+00 : f32
    %6 = vector.broadcast %cst_5 : f32 to vector<16x128xf32>
    %7 = arith.maximumf %5, %6 : vector<16x128xf32>
    %8 = arith.truncf %7 : vector<16x128xf32> to vector<16x128xbf16>
    %c0_6 = arith.constant 0 : index
    %c128 = arith.constant 128 : index
    %9 = vector.load %arg5[%c0_6, %c128] : memref<1x384xf32, #tpu.memory_space<vmem>>, vector<1x128xf32>
    %c0_7 = arith.constant 0 : index
    %c0_8 = arith.constant 0 : index
    %10 = vector.load %arg3[%c0_7, %c0_8] : memref<128x128xbf16, #tpu.memory_space<vmem>>, vector<128x128xbf16>
    %cst_9 = arith.constant dense<0.000000e+00> : vector<16x128xf32>
    %11 = tpu.matmul %8, %10, %cst_9 {dimension_numbers = #tpu.dot_dimension_numbers<[1], [0], [0], [1], [0, 0, 1, 1], [], []>} : vector<16x128xbf16>, vector<128x128xbf16>, vector<16x128xf32> -> vector<16x128xf32>
    %12 = vector.broadcast %9 : vector<1x128xf32> to vector<16x128xf32>
    %13 = arith.addf %11, %12 : vector<16x128xf32>
    %cst_10 = arith.constant 0.000000e+00 : f32
    %14 = vector.broadcast %cst_10 : f32 to vector<16x128xf32>
    %15 = arith.maximumf %13, %14 : vector<16x128xf32>
    %16 = arith.truncf %15 : vector<16x128xf32> to vector<16x128xbf16>
    %c0_11 = arith.constant 0 : index
    %c256 = arith.constant 256 : index
    %17 = vector.load %arg5[%c0_11, %c256] : memref<1x384xf32, #tpu.memory_space<vmem>>, vector<1x128xf32>
    %c0_12 = arith.constant 0 : index
    %c0_13 = arith.constant 0 : index
    %18 = vector.load %arg4[%c0_12, %c0_13] : memref<128x128xbf16, #tpu.memory_space<vmem>>, vector<128x128xbf16>
    %cst_14 = arith.constant dense<0.000000e+00> : vector<16x128xf32>
    %19 = tpu.matmul %16, %18, %cst_14 {dimension_numbers = #tpu.dot_dimension_numbers<[1], [0], [0], [1], [0, 0, 1, 1], [], []>} : vector<16x128xbf16>, vector<128x128xbf16>, vector<16x128xf32> -> vector<16x128xf32>
    %20 = vector.broadcast %17 : vector<1x128xf32> to vector<16x128xf32>
    %21 = arith.addf %19, %20 : vector<16x128xf32>
    %cst_15 = arith.constant 5.000000e-01 : f32
    %22 = vector.broadcast %cst_15 : f32 to vector<16x128xf32>
    %23 = arith.mulf %22, %21 : vector<16x128xf32>
    %24 = math.tanh %23 : vector<16x128xf32>
    %cst_16 = arith.constant 5.000000e-01 : f32
    %25 = vector.broadcast %cst_16 : f32 to vector<16x128xf32>
    %26 = arith.mulf %25, %24 : vector<16x128xf32>
    %cst_17 = arith.constant 5.000000e-01 : f32
    %27 = vector.broadcast %cst_17 : f32 to vector<16x128xf32>
    %28 = arith.addf %26, %27 : vector<16x128xf32>
    %29 = arith.truncf %28 : vector<16x128xf32> to vector<16x128xbf16>
    %c0_18 = arith.constant 0 : index
    %c0_19 = arith.constant 0 : index
    %30 = vector.load %arg6[%c0_18, %c0_19] : memref<16x128xbf16, #tpu.memory_space<vmem>>, vector<16x128xbf16>
    tpu.vector_store %arg6[%c0_18, %c0_19], %29 {strides = array<i32>} : memref<16x128xbf16, #tpu.memory_space<vmem>>, vector<16x128xbf16>,
    return
  }
  func.func @transform_0(%arg0: i32) -> (i32, i32) {
    %c0_i32 = arith.constant 0 : i32
    %c0_i32_0 = arith.constant 0 : i32
    return %arg0, %c0_i32 : i32, i32
  }
  func.func @transform_1(%arg0: i32) -> (i32, i32) {
    %c0_i32 = arith.constant 0 : i32
    %c0_i32_0 = arith.constant 0 : i32
    %c0_i32_1 = arith.constant 0 : i32
    return %c0_i32, %c0_i32_0 : i32, i32
  }
  func.func @transform_2(%arg0: i32) -> (i32, i32) {
    %c0_i32 = arith.constant 0 : i32
    %c0_i32_0 = arith.constant 0 : i32
    %c0_i32_1 = arith.constant 0 : i32
    return %c0_i32, %c0_i32_0 : i32, i32
  }
  func.func @transform_3(%arg0: i32) -> (i32, i32) {
    %c0_i32 = arith.constant 0 : i32
    %c0_i32_0 = arith.constant 0 : i32
    %c0_i32_1 = arith.constant 0 : i32
    return %c0_i32, %c0_i32_0 : i32, i32
  }
  func.func @transform_4(%arg0: i32) -> (i32, i32) {
    %c0_i32 = arith.constant 0 : i32
    %c0_i32_0 = arith.constant 0 : i32
    %c0_i32_1 = arith.constant 0 : i32
    return %c0_i32, %c0_i32_0 : i32, i32
  }
  func.func @transform_5(%arg0: i32) -> (i32, i32) {
    %c0_i32 = arith.constant 0 : i32
    %c0_i32_0 = arith.constant 0 : i32
    return %arg0, %c0_i32 : i32, i32
  }
}

</mosaic_0001>

<bundles_post_ra>
// kernel: tpu_custom_call.1
= control target key start
LH: loop header
LB: loop body
LE: loop exit
PB: predicated region body
PF: predicated region fallthrough
CT: control target
= control target key end

     0   :  { %10 = vsyncpa [#allocation3], 0  ;;  %s911_s0 = inlined_call_operand.hbm [shape: bf16[16,128], index: 0, kind: input, shape index: {}]   ;;  %s912_s1 = inlined_call_operand.hbm [shape: bf16[128,128], index: 1, kind: input, shape index: {}]   ;;  %s913_s2 = inlined_call_operand.hbm [shape: bf16[128,128], index: 2, kind: input, shape index: {}]   ;;  %s914_s3 = inlined_call_operand.hbm [shape: bf16[128,128], index: 3, kind: input, shape index: {}]   ;;  %s915_s4 = inlined_call_operand.vmem [shape: f32[1,384], index: 4, kind: input, shape index: {}]   ;;  %s916_s5 = inlined_call_operand.hbm [shape: bf16[16,128], index: 5, kind: output, shape index: {}]  }
   0x1   :  { %11 = vsyncpa [#allocation6], 0 }
   0x2   :  { %12 = vsyncpa [#allocation9], 0 }
   0x3   :  { %13 = vsyncpa [#allocation4], 0  ;;  %s744_s18 = smov [#allocation5]   ;;  %s745_s20 = smov [#allocation2]  }
   0x4   :  { %s31_s19 = sshll.u32 %s744_s18, 4  ;;  %s19_s21 = sshll.u32 %s745_s20, 4  ;;  %s32_s19 = int_to_ptr.vmem [resolvable:$true] %s31_s19  ;;  %s783_s21 = int_to_ptr.vmem [resolvable:$true] %s19_s21 }
   0x5   :  { %s626_s24 = scalar_lea.hbm %s912_s1, 1024 }
   0x6   :  { %p627_p0 = scmp.ne.s32.totalorder %s912_s1, %s626_s24  ;;  %p630_p1 = scmp.lt.u32.totalorder %s626_s24, %s912_s1 }
   0x8   :  { %p632_p2 = pnand %p630_p1, %p627_p0 }
   0xa   :  { %635 = shalt.err (!%p632_p2)
}
   0xb   :  { %s636_s29 = scalar_lea.vmem %s32_s19, 1024  ;;  %p641_p4 = scmp.lt.s32.totalorder %s32_s19, %s32_s19 }
   0xc   :  { %p637_p3 = scmp.ne.s32.totalorder %s32_s19, %s636_s29  ;;  %p642_p5 = scmp.lt.s32.totalorder %s636_s29, %s636_s29 }
   0xe   :  { %p643_p6 = por %p642_p5, %p641_p4 }
  0x10   :  { %p644_p7 = pnand %p643_p6, %p637_p3 }
  0x12   :  { %647 = shalt.err (!%p644_p7)
}
  0x13   :  { %s746_s30 = smov 64   ;;  %s747_s6 = smov 4  }
  0x14   :  { %37 = dma.hbm_to_vmem [thread:$0]  %s912_s1, 1024, %s32_s19, [#allocation6], %s746_s30, %s746_s30, %s747_s6  }
  0x15   :  { %s648_s11 = scalar_lea.hbm %s911_s0, 128 }
  0x16   :  { %p649_p8 = scmp.ne.s32.totalorder %s911_s0, %s648_s11  ;;  %p652_p9 = scmp.lt.u32.totalorder %s648_s11, %s911_s0 }
  0x18   :  { %p654_p10 = pnand %p652_p9, %p649_p8 }
  0x1a   :  { %657 = shalt.err (!%p654_p10)
}
  0x1b   :  { %s658_s16 = scalar_lea.vmem %s783_s21, 128  ;;  %p663_p12 = scmp.lt.s32.totalorder %s783_s21, %s783_s21 }
  0x1c   :  { %p659_p11 = scmp.ne.s32.totalorder %s783_s21, %s658_s16  ;;  %p664_p13 = scmp.lt.s32.totalorder %s658_s16, %s658_s16 }
  0x1e   :  { %p665_p0 = por %p664_p13, %p663_p12 }
  0x20   :  { %p666_p1 = pnand %p665_p0, %p659_p11 }
  0x22   :  { %669 = shalt.err (!%p666_p1)
}
  0x23   :  { %25 = dma.hbm_to_vmem [thread:$0]  %s911_s0, 128, %s783_s21, [#allocation3], %s746_s30, %s746_s30, %s747_s6  }
  0x24   :  { %s748_s18 = smov [#allocation7]   ;;  %s749_s20 = smov [#allocation8]  }
  0x25   :  { %s43_s19 = sshll.u32 %s748_s18, 4  ;;  %s55_s22 = sshll.u32 %s749_s20, 4  ;;  %s44_s19 = int_to_ptr.vmem [resolvable:$true] %s43_s19  ;;  %s820_s22 = int_to_ptr.vmem [resolvable:$true] %s55_s22 }
  0x26   :  { %s670_s25 = scalar_lea.hbm %s913_s2, 1024 }
  0x27   :  { %p671_p2 = scmp.ne.s32.totalorder %s913_s2, %s670_s25  ;;  %p674_p3 = scmp.lt.u32.totalorder %s670_s25, %s913_s2 }
  0x29   :  { %p676_p4 = pnand %p674_p3, %p671_p2 }
  0x2b   :  { %679 = shalt.err (!%p676_p4)
}
  0x2c   :  { %s680_s0 = scalar_lea.vmem %s44_s19, 1024  ;;  %p685_p6 = scmp.lt.s32.totalorder %s44_s19, %s44_s19 }
  0x2d   :  { %p681_p5 = scmp.ne.s32.totalorder %s44_s19, %s680_s0  ;;  %p686_p7 = scmp.lt.s32.totalorder %s680_s0, %s680_s0 }
  0x2f   :  { %p687_p8 = por %p686_p7, %p685_p6 }
  0x31   :  { %p688_p9 = pnand %p687_p8, %p681_p5 }
  0x33   :  { %691 = shalt.err (!%p688_p9)
}
  0x34   :  { %49 = dma.hbm_to_vmem [thread:$0]  %s913_s2, 1024, %s44_s19, [#allocation6], %s746_s30, %s746_s30, %s747_s6  }
  0x35   :  { %s692_s10 = scalar_lea.hbm %s914_s3, 1024 }
  0x36   :  { %p693_p10 = scmp.ne.s32.totalorder %s914_s3, %s692_s10  ;;  %p696_p11 = scmp.lt.u32.totalorder %s692_s10, %s914_s3 }
  0x38   :  { %p698_p12 = pnand %p696_p11, %p693_p10 }
  0x3a   :  { %701 = shalt.err (!%p698_p12)
}
  0x3b   :  { %s702_s15 = scalar_lea.vmem %s820_s22, 1024  ;;  %p707_p0 = scmp.lt.s32.totalorder %s820_s22, %s820_s22 }
  0x3c   :  { %p703_p13 = scmp.ne.s32.totalorder %s820_s22, %s702_s15  ;;  %p708_p1 = scmp.lt.s32.totalorder %s702_s15, %s702_s15 }
  0x3e   :  { %p709_p2 = por %p708_p1, %p707_p0 }
  0x40   :  { %p710_p3 = pnand %p709_p2, %p703_p13 }
  0x42   :  { %713 = shalt.err (!%p710_p3)
}
  0x43   :  { %61 = dma.hbm_to_vmem [thread:$0]  %s914_s3, 1024, %s820_s22, [#allocation9], %s746_s30, %s746_s30, %s747_s6  }
  0x44   :  { %736 = dma.done.wait [#allocation3], 128  }
  0x45   :  { %737 = vsyncadd [#allocation3], 4294967168 }
  0x46   :  { %738 = dma.done.wait [#allocation6], 2048  }
  0x47   :  { %739 = vsyncadd [#allocation6], 4294965248 }
  0x48   :  { %740 = dma.done.wait [#allocation9], 1024  }
  0x49   :  { %741 = vsyncadd [#allocation9], 4294966272  ;;  %v750_v0 = vmov 0.0   ;;  %vm751_vm0 = vmmov 0   ;;  %v597_v1 = vld [vmem:[#allocation5] sm:$0xff]   ;;  %v598_v2 = vld [vmem:[#allocation5 + $0x8] sm:$0xff]  }
  0x4a   :  { %528 = vmatprep.subr.bf16.mxu0 %v750_v0  ;;  %544 = vmatprep.mubr.msk.bf16.mxu0 %vm751_vm0, %v750_v0  ;;  %v599_v3 = vld [vmem:[#allocation5 + $0x10] sm:$0xff]   ;;  %v606_v4 = vld [vmem:[#allocation7] sm:$0xff]   ;;  %v600_v5 = vld [vmem:[#allocation5 + $0x18] sm:$0xff]   ;;  %s752_s22 = smov [#allocation10]  }
  0x4b   :  { %548 = vmatprep.subr.bf16.mxu1 %v750_v0  ;;  %564 = vmatprep.mubr.msk.bf16.mxu1 %vm751_vm0, %v750_v0  ;;  %v607_v6 = vld [vmem:[#allocation7 + $0x8] sm:$0xff]   ;;  %v601_v7 = vld [vmem:[#allocation5 + $0x20] sm:$0xff]   ;;  %v608_v8 = vld [vmem:[#allocation7 + $0x10] sm:$0xff]   ;;  %s450_s23 = sshll.u32 %s752_s22, 4  ;;  %s451_s23 = int_to_ptr.vmem [resolvable:$true] %s450_s23 }
  0x4c   :  { %529 = vmatpush3.bf16.msra.mxu0 %v597_v1  ;;  %549 = vmatpush3.bf16.msra.mxu1 %v606_v4  ;;  %v602_v9 = vld [vmem:[#allocation5 + $0x28] sm:$0xff]   ;;  %v609_v10 = vld [vmem:[#allocation7 + $0x18] sm:$0xff]   ;;  %v603_v11 = vld [vmem:[#allocation5 + $0x30] sm:$0xff]   ;;  %p719_p5 = scmp.lt.s32.totalorder %s451_s23, %s451_s23 }
  0x4d   :  { %530 = vmatprep.subr.bf16.mxu0 %v750_v0  ;;  %550 = vmatprep.subr.bf16.mxu1 %v750_v0  ;;  %v610_v12 = vld [vmem:[#allocation7 + $0x20] sm:$0xff]   ;;  %v604_v13 = vld [vmem:[#allocation5 + $0x38] sm:$0xff]   ;;  %v611_v14 = vld [vmem:[#allocation7 + $0x28] sm:$0xff]  }
  0x4e   :  { %v605_v15 = vld [vmem:[#allocation2] sm:$0xff]   ;;  %v612_v16 = vld [vmem:[#allocation7 + $0x30] sm:$0xff]   ;;  %v614_v18 = vld [vmem:[#allocation8] sm:$0xff]  }
  0x4f   :  { %v613_v17 = vld [vmem:[#allocation7 + $0x38] sm:$0xff]   ;;  %v615_v19 = vld [vmem:[#allocation8 + $0x8] sm:$0xff]   ;;  %v616_v20 = vld [vmem:[#allocation8 + $0x10] sm:$0xff]  }
  0x50   :  { %531 = vmatpush3.bf16.msra.mxu0 %v598_v2  ;;  %551 = vmatpush3.bf16.msra.mxu1 %v607_v6  ;;  %v617_v21 = vld [vmem:[#allocation8 + $0x18] sm:$0xff]   ;;  %v618_v22 = vld [vmem:[#allocation8 + $0x20] sm:$0xff]   ;;  %v619_v23 = vld [vmem:[#allocation8 + $0x28] sm:$0xff]  }
  0x51   :  { %532 = vmatprep.subr.bf16.mxu0 %v750_v0  ;;  %552 = vmatprep.subr.bf16.mxu1 %v750_v0  ;;  %v464_v24 = vld [vmem:[%s915_s4] ss:$0 sm:$0xff]  ;;  %v620_v34 = vld [vmem:[#allocation8 + $0x30] sm:$0xff]   ;;  %v474_v36 = vld [vmem:[%s915_s4 + $0x1] ss:$0 sm:$0xff] }
  0x52   :  { %v621_v35 = vld [vmem:[#allocation8 + $0x38] sm:$0xff]  }
  0x53   :  { %v483_v46 = vld [vmem:[%s915_s4 + $0x2] ss:$0 sm:$0xff]  ;;  %s714_s4 = scalar_lea.vmem %s451_s23, 128 }
  0x54   :  { %533 = vmatpush3.bf16.msra.mxu0 %v599_v3  ;;  %553 = vmatpush3.bf16.msra.mxu1 %v608_v8  ;;  %p715_p4 = scmp.ne.s32.totalorder %s451_s23, %s714_s4  ;;  %p720_p6 = scmp.lt.s32.totalorder %s714_s4, %s714_s4 }
  0x55   :  { %534 = vmatprep.subr.bf16.mxu0 %v750_v0  ;;  %554 = vmatprep.subr.bf16.mxu1 %v750_v0 }
  0x56   :  { %p721_p7 = por %p720_p6, %p719_p5 }
  0x58   :  { %535 = vmatpush3.bf16.msra.mxu0 %v600_v5  ;;  %555 = vmatpush3.bf16.msra.mxu1 %v609_v10  ;;  %p722_p8 = pnand %p721_p7, %p715_p4 }
  0x59   :  { %536 = vmatprep.subr.bf16.mxu0 %v750_v0  ;;  %556 = vmatprep.subr.bf16.mxu1 %v750_v0 }
  0x5c   :  { %537 = vmatpush3.bf16.msra.mxu0 %v601_v7  ;;  %557 = vmatpush3.bf16.msra.mxu1 %v610_v12 }
  0x5d   :  { %538 = vmatprep.subr.bf16.mxu0 %v750_v0  ;;  %558 = vmatprep.subr.bf16.mxu1 %v750_v0 }
  0x60   :  { %539 = vmatpush3.bf16.msra.mxu0 %v602_v9  ;;  %559 = vmatpush3.bf16.msra.mxu1 %v611_v14 }
  0x61   :  { %540 = vmatprep.subr.bf16.mxu0 %v750_v0  ;;  %560 = vmatprep.subr.bf16.mxu1 %v750_v0 }
  0x64   :  { %541 = vmatpush3.bf16.msra.mxu0 %v603_v11  ;;  %561 = vmatpush3.bf16.msra.mxu1 %v612_v16 }
  0x65   :  { %542 = vmatprep.subr.bf16.mxu0 %v750_v0  ;;  %562 = vmatprep.subr.bf16.mxu1 %v750_v0 }
  0x68   :  { %543 = vmatpush3.bf16.msra.mxu0 %v604_v13  ;;  %563 = vmatpush3.bf16.msra.mxu1 %v613_v17 }
  0x69   :  { %568 = vmatprep.subr.bf16.mxu0 %v750_v0 }
  0x6b   :  { %545 = vmatmul.mubr.bf16.vlgmr.msra.gmra.mrb[0].mxu0 %v605_v15 }
  0x6c   :  { %584 = vmatprep.mubr.msk.bf16.mxu0 %vm751_vm0, %v750_v0  ;;  %569 = vmatpush3.bf16.msra.mxu0 %v614_v18 }
  0x6d   :  { %570 = vmatprep.subr.bf16.mxu0 %v750_v0 }
  0x70   :  { %571 = vmatpush3.bf16.msra.mxu0 %v615_v19 }
  0x71   :  { %572 = vmatprep.subr.bf16.mxu0 %v750_v0 }
  0x74   :  { %573 = vmatpush3.bf16.msra.mxu0 %v616_v20 }
  0x75   :  { %574 = vmatprep.subr.bf16.mxu0 %v750_v0 }
  0x78   :  { %575 = vmatpush3.bf16.msra.mxu0 %v617_v21 }
  0x79   :  { %576 = vmatprep.subr.bf16.mxu0 %v750_v0 }
  0x7c   :  { %577 = vmatpush3.bf16.msra.mxu0 %v618_v22 }
  0x7d   :  { %578 = vmatprep.subr.bf16.mxu0 %v750_v0 }
  0x80   :  { %579 = vmatpush3.bf16.msra.mxu0 %v619_v23 }
  0x81   :  { %580 = vmatprep.subr.bf16.mxu0 %v750_v0 }
  0x84   :  { %581 = vmatpush3.bf16.msra.mxu0 %v620_v34 }
  0x85   :  { %582 = vmatprep.subr.bf16.mxu0 %v750_v0 }
  0x88   :  { %583 = vmatpush3.bf16.msra.mxu0 %v621_v35 }
 0x13e   :  { %v190_v25 = vpop.f32.mrb[0].mxu0 }
 0x13f   :  { %v191_v26 = vadd.f32 %v464_v24, %v190_v25  ;;  %v546_v27 = vpop.f32.mrb[1].mxu0 }
 0x140   :  { %v193_v28 = vpop.f32.mrb[2].mxu0 }
 0x141   :  { %v194_v29 = vadd.f32 %v464_v24, %v193_v28  ;;  %v547_v30 = vpop.f32.mrb[3].mxu0  ;;  %v197_v31 = vmax.f32 %v191_v26, 0.0 }
 0x143   :  { %v198_v32 = vmax.f32 %v194_v29, 0.0 }
 0x145   :  { %v199_v33 = vpack.c.bf16 %v198_v32, %v197_v31 }
 0x147   :  { %565 = vmatmul.mubr.bf16.vlgmr.msra.gmra.mrb[0].mxu1 %v199_v33 }
 0x21a   :  { %v305_v37 = vpop.f32.mrb[0].mxu1 }
 0x21b   :  { %v306_v38 = vadd.f32 %v474_v36, %v305_v37  ;;  %v566_v39 = vpop.f32.mrb[1].mxu1 }
 0x21c   :  { %v308_v40 = vpop.f32.mrb[2].mxu1 }
 0x21d   :  { %v309_v41 = vadd.f32 %v474_v36, %v308_v40  ;;  %v567_v42 = vpop.f32.mrb[3].mxu1  ;;  %v312_v43 = vmax.f32 %v306_v38, 0.0 }
 0x21f   :  { %v313_v44 = vmax.f32 %v309_v41, 0.0 }
 0x221   :  { %v314_v45 = vpack.c.bf16 %v313_v44, %v312_v43 }
 0x223   :  { %585 = vmatmul.mubr.bf16.vlgmr.msra.gmra.mrb[4].mxu0 %v314_v45 }
 0x2f6   :  { %v420_v47 = vpop.f32.mrb[4].mxu0 }
 0x2f7   :  { %v421_v48 = vadd.f32 %v483_v46, %v420_v47  ;;  %v586_v49 = vpop.f32.mrb[5].mxu0 }
 0x2f8   :  { %v423_v50 = vpop.f32.mrb[6].mxu0 }
 0x2f9   :  { %v427_v51 = vmul.f32 0.5, %v421_v48  ;;  %v424_v52 = vadd.f32 %v483_v46, %v423_v50  ;;  %v587_v53 = vpop.f32.mrb[7].mxu0 }
 0x2fb   :  { %622 = vtanh.f32 %v427_v51  ;;  %v428_v54 = vmul.f32 0.5, %v424_v52 }
 0x2fd   :  { %624 = vtanh.f32 %v428_v54 }
 0x305   :  { %v623_v55 = vpop.eup %622 }
 0x306   :  { %v431_v56 = vmul.f32 0.5, %v623_v55 }
 0x307   :  { %v625_v57 = vpop.eup %624 }
 0x308   :  { %v432_v58 = vmul.f32 0.5, %v625_v57  ;;  %v433_v59 = vadd.f32 0.5, %v431_v56 }
 0x30a   :  { %v434_v60 = vadd.f32 0.5, %v432_v58 }
 0x30c   :  { %v499_v61 = vpack.c.bf16 %v434_v60, %v433_v59 }
 0x30e   :  { %500 = vst [vmem:[#allocation10] sm:$0xff] %v499_v61  }
 0x30f   :  { %725 = shalt.err (!%p722_p8)
}
 0x310   :  { %s726_s26 = scalar_lea.hbm %s916_s5, 128 }
 0x311   :  { %p727_p9 = scmp.ne.s32.totalorder %s916_s5, %s726_s26  ;;  %p730_p10 = scmp.lt.u32.totalorder %s726_s26, %s916_s5 }
 0x313   :  { %p732_p11 = pnand %p730_p10, %p727_p9 }
 0x315   :  { %735 = shalt.err (!%p732_p11)
}
 0x316   :  { %456 = dma.vmem_to_hbm [thread:$0]  %s451_s23, 128, %s916_s5, [#allocation4], %s746_s30, %s746_s30, %s747_s6  }
 0x317   :  { %742 = dma.done.wait [#allocation4], 128  }
 0x318   :  { %743 = vsyncadd [#allocation4], 4294967168 }
 0x319   :  { %460 = vsyncpa [#allocation3], 1 }
 0x31a   :  { %461 = vsyncpa [#allocation6], 1 }
 0x31b   :  { %462 = vsyncpa [#allocation9], 1 }
 0x31c   :  { %463 = vsyncpa [#allocation4], 1 }

// kernel: tpu_custom_call.1
= control target key start
LH: loop header
LB: loop body
LE: loop exit
PB: predicated region body
PF: predicated region fallthrough
CT: control target
= control target key end

     0   :  { %10 = vsyncpa [#allocation3], 0  ;;  %s911_s0 = inlined_call_operand.hbm [shape: bf16[16,128], index: 0, kind: input, shape index: {}]   ;;  %s912_s1 = inlined_call_operand.hbm [shape: bf16[128,128], index: 1, kind: input, shape index: {}]   ;;  %s913_s2 = inlined_call_operand.hbm [shape: bf16[128,128], index: 2, kind: input, shape index: {}]   ;;  %s914_s3 = inlined_call_operand.hbm [shape: bf16[128,128], index: 3, kind: input, shape index: {}]   ;;  %s915_s4 = inlined_call_operand.vmem [shape: f32[1,384], index: 4, kind: input, shape index: {}]   ;;  %s916_s5 = inlined_call_operand.hbm [shape: bf16[16,128], index: 5, kind: output, shape index: {}]  }
   0x1   :  { %11 = vsyncpa [#allocation6], 0 }
   0x2   :  { %12 = vsyncpa [#allocation9], 0 }
   0x3   :  { %13 = vsyncpa [#allocation4], 0  ;;  %s744_s18 = smov [#allocation5]   ;;  %s745_s20 = smov [#allocation2]  }
   0x4   :  { %s31_s19 = sshll.u32 %s744_s18, 4  ;;  %s19_s21 = sshll.u32 %s745_s20, 4  ;;  %s32_s19 = int_to_ptr.vmem [resolvable:$true] %s31_s19  ;;  %s783_s21 = int_to_ptr.vmem [resolvable:$true] %s19_s21 }
   0x5   :  { %s626_s24 = scalar_lea.hbm %s912_s1, 1024 }
   0x6   :  { %p627_p0 = scmp.ne.s32.totalorder %s912_s1, %s626_s24  ;;  %p630_p1 = scmp.lt.u32.totalorder %s626_s24, %s912_s1 }
   0x8   :  { %p632_p2 = pnand %p630_p1, %p627_p0 }
   0xa   :  { %635 = shalt.err (!%p632_p2)
}
   0xb   :  { %s636_s29 = scalar_lea.vmem %s32_s19, 1024  ;;  %p641_p4 = scmp.lt.s32.totalorder %s32_s19, %s32_s19 }
   0xc   :  { %p637_p3 = scmp.ne.s32.totalorder %s32_s19, %s636_s29  ;;  %p642_p5 = scmp.lt.s32.totalorder %s636_s29, %s636_s29 }
   0xe   :  { %p643_p6 = por %p642_p5, %p641_p4 }
  0x10   :  { %p644_p7 = pnand %p643_p6, %p637_p3 }
  0x12   :  { %647 = shalt.err (!%p644_p7)
}
  0x13   :  { %s746_s30 = smov 64   ;;  %s747_s6 = smov 4  }
  0x14   :  { %37 = dma.hbm_to_vmem [thread:$0]  %s912_s1, 1024, %s32_s19, [#allocation6], %s746_s30, %s746_s30, %s747_s6  }
  0x15   :  { %s648_s11 = scalar_lea.hbm %s911_s0, 128 }
  0x16   :  { %p649_p8 = scmp.ne.s32.totalorder %s911_s0, %s648_s11  ;;  %p652_p9 = scmp.lt.u32.totalorder %s648_s11, %s911_s0 }
  0x18   :  { %p654_p10 = pnand %p652_p9, %p649_p8 }
  0x1a   :  { %657 = shalt.err (!%p654_p10)
}
  0x1b   :  { %s658_s16 = scalar_lea.vmem %s783_s21, 128  ;;  %p663_p12 = scmp.lt.s32.totalorder %s783_s21, %s783_s21 }
  0x1c   :  { %p659_p11 = scmp.ne.s32.totalorder %s783_s21, %s658_s16  ;;  %p664_p13 = scmp.lt.s32.totalorder %s658_s16, %s658_s16 }
  0x1e   :  { %p665_p0 = por %p664_p13, %p663_p12 }
  0x20   :  { %p666_p1 = pnand %p665_p0, %p659_p11 }
  0x22   :  { %669 = shalt.err (!%p666_p1)
}
  0x23   :  { %25 = dma.hbm_to_vmem [thread:$0]  %s911_s0, 128, %s783_s21, [#allocation3], %s746_s30, %s746_s30, %s747_s6  }
  0x24   :  { %s748_s18 = smov [#allocation7]   ;;  %s749_s20 = smov [#allocation8]  }
  0x25   :  { %s43_s19 = sshll.u32 %s748_s18, 4  ;;  %s55_s22 = sshll.u32 %s749_s20, 4  ;;  %s44_s19 = int_to_ptr.vmem [resolvable:$true] %s43_s19  ;;  %s820_s22 = int_to_ptr.vmem [resolvable:$true] %s55_s22 }
  0x26   :  { %s670_s25 = scalar_lea.hbm %s913_s2, 1024 }
  0x27   :  { %p671_p2 = scmp.ne.s32.totalorder %s913_s2, %s670_s25  ;;  %p674_p3 = scmp.lt.u32.totalorder %s670_s25, %s913_s2 }
  0x29   :  { %p676_p4 = pnand %p674_p3, %p671_p2 }
  0x2b   :  { %679 = shalt.err (!%p676_p4)
}
  0x2c   :  { %s680_s0 = scalar_lea.vmem %s44_s19, 1024  ;;  %p685_p6 = scmp.lt.s32.totalorder %s44_s19, %s44_s19 }
  0x2d   :  { %p681_p5 = scmp.ne.s32.totalorder %s44_s19, %s680_s0  ;;  %p686_p7 = scmp.lt.s32.totalorder %s680_s0, %s680_s0 }
  0x2f   :  { %p687_p8 = por %p686_p7, %p685_p6 }
  0x31   :  { %p688_p9 = pnand %p687_p8, %p681_p5 }
  0x33   :  { %691 = shalt.err (!%p688_p9)
}
  0x34   :  { %49 = dma.hbm_to_vmem [thread:$0]  %s913_s2, 1024, %s44_s19, [#allocation6], %s746_s30, %s746_s30, %s747_s6  }
  0x35   :  { %s692_s10 = scalar_lea.hbm %s914_s3, 1024 }
  0x36   :  { %p693_p10 = scmp.ne.s32.totalorder %s914_s3, %s692_s10  ;;  %p696_p11 = scmp.lt.u32.totalorder %s692_s10, %s914_s3 }
  0x38   :  { %p698_p12 = pnand %p696_p11, %p693_p10 }
  0x3a   :  { %701 = shalt.err (!%p698_p12)
}
  0x3b   :  { %s702_s15 = scalar_lea.vmem %s820_s22, 1024  ;;  %p707_p0 = scmp.lt.s32.totalorder %s820_s22, %s820_s22 }
  0x3c   :  { %p703_p13 = scmp.ne.s32.totalorder %s820_s22, %s702_s15  ;;  %p708_p1 = scmp.lt.s32.totalorder %s702_s15, %s702_s15 }
  0x3e   :  { %p709_p2 = por %p708_p1, %p707_p0 }
  0x40   :  { %p710_p3 = pnand %p709_p2, %p703_p13 }
  0x42   :  { %713 = shalt.err (!%p710_p3)
}
  0x43   :  { %61 = dma.hbm_to_vmem [thread:$0]  %s914_s3, 1024, %s820_s22, [#allocation9], %s746_s30, %s746_s30, %s747_s6  }
  0x44   :  { %736 = dma.done.wait [#allocation3], 128  }
  0x45   :  { %737 = vsyncadd [#allocation3], 4294967168 }
  0x46   :  { %738 = dma.done.wait [#allocation6], 2048  }
  0x47   :  { %739 = vsyncadd [#allocation6], 4294965248 }
  0x48   :  { %740 = dma.done.wait [#allocation9], 1024  }
  0x49   :  { %741 = vsyncadd [#allocation9], 4294966272  ;;  %v750_v0 = vmov 0.0   ;;  %vm751_vm0 = vmmov 0   ;;  %v597_v1 = vld [vmem:[#allocation5] sm:$0xff]   ;;  %v598_v2 = vld [vmem:[#allocation5 + $0x8] sm:$0xff]  }
  0x4a   :  { %528 = vmatprep.subr.bf16.mxu0 %v750_v0  ;;  %544 = vmatprep.mubr.msk.bf16.mxu0 %vm751_vm0, %v750_v0  ;;  %v599_v3 = vld [vmem:[#allocation5 + $0x10] sm:$0xff]   ;;  %v606_v4 = vld [vmem:[#allocation7] sm:$0xff]   ;;  %v600_v5 = vld [vmem:[#allocation5 + $0x18] sm:$0xff]   ;;  %s752_s22 = smov [#allocation10]  }
  0x4b   :  { %548 = vmatprep.subr.bf16.mxu1 %v750_v0  ;;  %564 = vmatprep.mubr.msk.bf16.mxu1 %vm751_vm0, %v750_v0  ;;  %v607_v6 = vld [vmem:[#allocation7 + $0x8] sm:$0xff]   ;;  %v601_v7 = vld [vmem:[#allocation5 + $0x20] sm:$0xff]   ;;  %v608_v8 = vld [vmem:[#allocation7 + $0x10] sm:$0xff]   ;;  %s450_s23 = sshll.u32 %s752_s22, 4  ;;  %s451_s23 = int_to_ptr.vmem [resolvable:$true] %s450_s23 }
  0x4c   :  { %529 = vmatpush3.bf16.msra.mxu0 %v597_v1  ;;  %549 = vmatpush3.bf16.msra.mxu1 %v606_v4  ;;  %v602_v9 = vld [vmem:[#allocation5 + $0x28] sm:$0xff]   ;;  %v609_v10 = vld [vmem:[#allocation7 + $0x18] sm:$0xff]   ;;  %v603_v11 = vld [vmem:[#allocation5 + $0x30] sm:$0xff]   ;;  %p719_p5 = scmp.lt.s32.totalorder %s451_s23, %s451_s23 }
  0x4d   :  { %530 = vmatprep.subr.bf16.mxu0 %v750_v0  ;;  %550 = vmatprep.subr.bf16.mxu1 %v750_v0  ;;  %v610_v12 = vld [vmem:[#allocation7 + $0x20] sm:$0xff]   ;;  %v604_v13 = vld [vmem:[#allocation5 + $0x38] sm:$0xff]   ;;  %v611_v14 = vld [vmem:[#allocation7 + $0x28] sm:$0xff]  }
  0x4e   :  { %v605_v15 = vld [vmem:[#allocation2] sm:$0xff]   ;;  %v612_v16 = vld [vmem:[#allocation7 + $0x30] sm:$0xff]   ;;  %v614_v18 = vld [vmem:[#allocation8] sm:$0xff]  }
  0x4f   :  { %v613_v17 = vld [vmem:[#allocation7 + $0x38] sm:$0xff]   ;;  %v615_v19 = vld [vmem:[#allocation8 + $0x8] sm:$0xff]   ;;  %v616_v20 = vld [vmem:[#allocation8 + $0x10] sm:$0xff]  }
  0x50   :  { %531 = vmatpush3.bf16.msra.mxu0 %v598_v2  ;;  %551 = vmatpush3.bf16.msra.mxu1 %v607_v6  ;;  %v617_v21 = vld [vmem:[#allocation8 + $0x18] sm:$0xff]   ;;  %v618_v22 = vld [vmem:[#allocation8 + $0x20] sm:$0xff]   ;;  %v619_v23 = vld [vmem:[#allocation8 + $0x28] sm:$0xff]  }
  0x51   :  { %532 = vmatprep.subr.bf16.mxu0 %v750_v0  ;;  %552 = vmatprep.subr.bf16.mxu1 %v750_v0  ;;  %v464_v24 = vld [vmem:[%s915_s4] ss:$0 sm:$0xff]  ;;  %v620_v34 = vld [vmem:[#allocation8 + $0x30] sm:$0xff]   ;;  %v474_v36 = vld [vmem:[%s915_s4 + $0x1] ss:$0 sm:$0xff] }
  0x52   :  { %v621_v35 = vld [vmem:[#allocation8 + $0x38] sm:$0xff]  }
  0x53   :  { %v483_v46 = vld [vmem:[%s915_s4 + $0x2] ss:$0 sm:$0xff]  ;;  %s714_s4 = scalar_lea.vmem %s451_s23, 128 }
  0x54   :  { %533 = vmatpush3.bf16.msra.mxu0 %v599_v3  ;;  %553 = vmatpush3.bf16.msra.mxu1 %v608_v8  ;;  %p715_p4 = scmp.ne.s32.totalorder %s451_s23, %s714_s4  ;;  %p720_p6 = scmp.lt.s32.totalorder %s714_s4, %s714_s4 }
  0x55   :  { %534 = vmatprep.subr.bf16.mxu0 %v750_v0  ;;  %554 = vmatprep.subr.bf16.mxu1 %v750_v0 }
  0x56   :  { %p721_p7 = por %p720_p6, %p719_p5 }
  0x58   :  { %535 = vmatpush3.bf16.msra.mxu0 %v600_v5  ;;  %555 = vmatpush3.bf16.msra.mxu1 %v609_v10  ;;  %p722_p8 = pnand %p721_p7, %p715_p4 }
  0x59   :  { %536 = vmatprep.subr.bf16.mxu0 %v750_v0  ;;  %556 = vmatprep.subr.bf16.mxu1 %v750_v0 }
  0x5c   :  { %537 = vmatpush3.bf16.msra.mxu0 %v601_v7  ;;  %557 = vmatpush3.bf16.msra.mxu1 %v610_v12 }
  0x5d   :  { %538 = vmatprep.subr.bf16.mxu0 %v750_v0  ;;  %558 = vmatprep.subr.bf16.mxu1 %v750_v0 }
  0x60   :  { %539 = vmatpush3.bf16.msra.mxu0 %v602_v9  ;;  %559 = vmatpush3.bf16.msra.mxu1 %v611_v14 }
  0x61   :  { %540 = vmatprep.subr.bf16.mxu0 %v750_v0  ;;  %560 = vmatprep.subr.bf16.mxu1 %v750_v0 }
  0x64   :  { %541 = vmatpush3.bf16.msra.mxu0 %v603_v11  ;;  %561 = vmatpush3.bf16.msra.mxu1 %v612_v16 }
  0x65   :  { %542 = vmatprep.subr.bf16.mxu0 %v750_v0  ;;  %562 = vmatprep.subr.bf16.mxu1 %v750_v0 }
  0x68   :  { %543 = vmatpush3.bf16.msra.mxu0 %v604_v13  ;;  %563 = vmatpush3.bf16.msra.mxu1 %v613_v17 }
  0x69   :  { %568 = vmatprep.subr.bf16.mxu0 %v750_v0 }
  0x6b   :  { %545 = vmatmul.mubr.bf16.vlgmr.msra.gmra.mrb[0].mxu0 %v605_v15 }
  0x6c   :  { %584 = vmatprep.mubr.msk.bf16.mxu0 %vm751_vm0, %v750_v0  ;;  %569 = vmatpush3.bf16.msra.mxu0 %v614_v18 }
  0x6d   :  { %570 = vmatprep.subr.bf16.mxu0 %v750_v0 }
  0x70   :  { %571 = vmatpush3.bf16.msra.mxu0 %v615_v19 }
  0x71   :  { %572 = vmatprep.subr.bf16.mxu0 %v750_v0 }
  0x74   :  { %573 = vmatpush3.bf16.msra.mxu0 %v616_v20 }
  0x75   :  { %574 = vmatprep.subr.bf16.mxu0 %v750_v0 }
  0x78   :  { %575 = vmatpush3.bf16.msra.mxu0 %v617_v21 }
  0x79   :  { %576 = vmatprep.subr.bf16.mxu0 %v750_v0 }
  0x7c   :  { %577 = vmatpush3.bf16.msra.mxu0 %v618_v22 }
  0x7d   :  { %578 = vmatprep.subr.bf16.mxu0 %v750_v0 }
  0x80   :  { %579 = vmatpush3.bf16.msra.mxu0 %v619_v23 }
  0x81   :  { %580 = vmatprep.subr.bf16.mxu0 %v750_v0 }
  0x84   :  { %581 = vmatpush3.bf16.msra.mxu0 %v620_v34 }
  0x85   :  { %582 = vmatprep.subr.bf16.mxu0 %v750_v0 }
  0x88   :  { %583 = vmatpush3.bf16.msra.mxu0 %v621_v35 }
 0x13e   :  { %v190_v25 = vpop.f32.mrb[0].mxu0 }
 0x13f   :  { %v191_v26 = vadd.f32 %v464_v24, %v190_v25  ;;  %v546_v27 = vpop.f32.mrb[1].mxu0 }
 0x140   :  { %v193_v28 = vpop.f32.mrb[2].mxu0 }
 0x141   :  { %v194_v29 = vadd.f32 %v464_v24, %v193_v28  ;;  %v547_v30 = vpop.f32.mrb[3].mxu0  ;;  %v197_v31 = vmax.f32 %v191_v26, 0.0 }
 0x143   :  { %v198_v32 = vmax.f32 %v194_v29, 0.0 }
 0x145   :  { %v199_v33 = vpack.c.bf16 %v198_v32, %v197_v31 }
 0x147   :  { %565 = vmatmul.mubr.bf16.vlgmr.msra.gmra.mrb[0].mxu1 %v199_v33 }
 0x21a   :  { %v305_v37 = vpop.f32.mrb[0].mxu1 }
 0x21b   :  { %v306_v38 = vadd.f32 %v474_v36, %v305_v37  ;;  %v566_v39 = vpop.f32.mrb[1].mxu1 }
 0x21c   :  { %v308_v40 = vpop.f32.mrb[2].mxu1 }
 0x21d   :  { %v309_v41 = vadd.f32 %v474_v36, %v308_v40  ;;  %v567_v42 = vpop.f32.mrb[3].mxu1  ;;  %v312_v43 = vmax.f32 %v306_v38, 0.0 }
 0x21f   :  { %v313_v44 = vmax.f32 %v309_v41, 0.0 }
 0x221   :  { %v314_v45 = vpack.c.bf16 %v313_v44, %v312_v43 }
 0x223   :  { %585 = vmatmul.mubr.bf16.vlgmr.msra.gmra.mrb[4].mxu0 %v314_v45 }
 0x2f6   :  { %v420_v47 = vpop.f32.mrb[4].mxu0 }
 0x2f7   :  { %v421_v48 = vadd.f32 %v483_v46, %v420_v47  ;;  %v586_v49 = vpop.f32.mrb[5].mxu0 }
 0x2f8   :  { %v423_v50 = vpop.f32.mrb[6].mxu0 }
 0x2f9   :  { %v427_v51 = vmul.f32 0.5, %v421_v48  ;;  %v424_v52 = vadd.f32 %v483_v46, %v423_v50  ;;  %v587_v53 = vpop.f32.mrb[7].mxu0 }
 0x2fb   :  { %622 = vtanh.f32 %v427_v51  ;;  %v428_v54 = vmul.f32 0.5, %v424_v52 }
 0x2fd   :  { %624 = vtanh.f32 %v428_v54 }
 0x305   :  { %v623_v55 = vpop.eup %622 }
 0x306   :  { %v431_v56 = vmul.f32 0.5, %v623_v55 }
 0x307   :  { %v625_v57 = vpop.eup %624 }
 0x308   :  { %v432_v58 = vmul.f32 0.5, %v625_v57  ;;  %v433_v59 = vadd.f32 0.5, %v431_v56 }
 0x30a   :  { %v434_v60 = vadd.f32 0.5, %v432_v58 }
 0x30c   :  { %v499_v61 = vpack.c.bf16 %v434_v60, %v433_v59 }
 0x30e   :  { %500 = vst [vmem:[#allocation10] sm:$0xff] %v499_v61  }
 0x30f   :  { %725 = shalt.err (!%p722_p8)
}
 0x310   :  { %s726_s26 = scalar_lea.hbm %s916_s5, 128 }
 0x311   :  { %p727_p9 = scmp.ne.s32.totalorder %s916_s5, %s726_s26  ;;  %p730_p10 = scmp.lt.u32.totalorder %s726_s26, %s916_s5 }
 0x313   :  { %p732_p11 = pnand %p730_p10, %p727_p9 }
 0x315   :  { %735 = shalt.err (!%p732_p11)
}
 0x316   :  { %456 = dma.vmem_to_hbm [thread:$0]  %s451_s23, 128, %s916_s5, [#allocation4], %s746_s30, %s746_s30, %s747_s6  }
 0x317   :  { %742 = dma.done.wait [#allocation4], 128  }
 0x318   :  { %743 = vsyncadd [#allocation4], 4294967168 }
 0x319   :  { %460 = vsyncpa [#allocation3], 1 }
 0x31a   :  { %461 = vsyncpa [#allocation6], 1 }
 0x31b   :  { %462 = vsyncpa [#allocation9], 1 }
 0x31c   :  { %463 = vsyncpa [#allocation4], 1 }

</bundles_post_ra>
